<compile_context>
chip_gen: v6e
topology: v6e:2x2x1
jax: 0.10.0
libtpu: 0.0.40
codegen_flags: <defaults>
</compile_context>

<pallas_src>
import functools
import math

import jax
import jax.numpy as jnp
from jax.experimental import pallas as pl
from jax.experimental.pallas import tpu as pltpu

N_PAD = 128  # output/lane padding of every layer (lane-dense stores)


def _round_up(x, m):
    return ((x + m - 1) // m) * m


def _mlp_kernel(inv_ref, po_ref, w_ref, o_ref, obs_ref, *, l, num_layers):
    """inv: (B,1); po: (B,P); w: (L, K_PAD, N_PAD) stored as (in, out) with the
    bias folded into row K_PAD-1; o: (B, N_PAD); obs_ref: (B, K_PAD) scratch."""
    b, k_pad = obs_ref.shape
    bias_lane = k_pad - 1

    # ---- assemble obs in VMEM: [inventory, past_orders[:, -l:], 0..., 1] ----
    obs_ref[...] = jnp.zeros_like(obs_ref)
    obs_ref[:, 0:1] = inv_ref[...]
    if l > 0:
        p = po_ref.shape[1]
        obs_ref[:, 1:1 + l] = po_ref[:, p - l:p]
    obs_ref[:, bias_lane:bias_lane + 1] = jnp.ones((b, 1), jnp.float32)

    h_in = obs_ref[...]                                        # (B, K_PAD)
    lane = jax.lax.broadcasted_iota(jnp.int32, (b, k_pad), 1)
    h = None
    for j in range(num_layers):  # static unroll (num_layers is a Python int)
        # Exact f32 MXU passes: floor() below is sensitive to near-integer flips.
        h = jnp.dot(h_in, w_ref[j],
                    preferred_element_type=jnp.float32,
                    precision=jax.lax.Precision.HIGHEST)
        h = jnp.maximum(h, 0.0)        # ReLU after EVERY layer, including last
        if j + 1 < num_layers:
            # Next layer input: real features (fan_out <= K_PAD-1 by packing)
            # plus the re-injected constant-1 bias lane.
            h_in = jnp.where(lane == bias_lane, 1.0, h[:, :k_pad])

    # allow_rounding_correction: h - frac(h) == floor(h) since h >= 0 after ReLU
    o_ref[...] = jnp.floor(h)


def mlp_pallas(current_inventory, past_orders, w_stack, *, l):
    """current_inventory: (B,1) f32; past_orders: (B,P) f32;
    w_stack: (L, K_PAD, N_PAD) f32 (bias folded). Returns (B, N_PAD) f32."""
    B = current_inventory.shape[0]
    num_layers, k_pad, n_pad = w_stack.shape
    vmem = pl.BlockSpec(memory_space=pltpu.MemorySpace.VMEM)
    cost = pl.CostEstimate(
        flops=int(2 * B * k_pad * n_pad * num_layers),
        transcendentals=0,
        bytes_accessed=int(4 * (w_stack.size + current_inventory.size
                                + past_orders.size + B * n_pad)),
    )
    return pl.pallas_call(
        functools.partial(_mlp_kernel, l=l, num_layers=num_layers),
        out_shape=jax.ShapeDtypeStruct((B, n_pad), jnp.float32),
        in_specs=[vmem, vmem, vmem],
        out_specs=vmem,
        scratch_shapes=[pltpu.VMEM((B, k_pad), jnp.float32)],
        cost_estimate=cost,
        compiler_params=pltpu.CompilerParams(vmem_limit_bytes=4 * 1024 * 1024),
    )(current_inventory, past_orders, w_stack)


def controller_forward(current_demand, current_inventory, past_orders, w_stack, *, l):
    # current_demand is unused by the reference forward (kept for signature parity)
    del current_demand
    h = mlp_pallas(current_inventory.astype(jnp.float32),
                   past_orders.astype(jnp.float32), w_stack, l=l)
    return h[:, 0:1]  # q  (slice fuses under the surrounding jit)


def init_params(key, l, n_hidden_units):
    """PyTorch-nn.Linear-style uniform init. Returns list of (W(out,in), b|None)."""
    if n_hidden_units is None:
        layer_dims = [(l + 1, 1, True)]
    else:
        layer_dims = [(l + 1, n_hidden_units[0], True)]
        for i in range(len(n_hidden_units) - 1):
            layer_dims.append((n_hidden_units[i], n_hidden_units[i + 1], True))
        layer_dims.append((n_hidden_units[-1], 1, False))  # output layer: bias=False
    params = []
    for fan_in, fan_out, has_bias in layer_dims:
        key, kw, kb = jax.random.split(key, 3)
        bound = 1.0 / math.sqrt(fan_in)
        w = jax.random.uniform(kw, (fan_out, fan_in), jnp.float32, -bound, bound)
        b = (jax.random.uniform(kb, (fan_out,), jnp.float32, -bound, bound)
             if has_bias else None)
        params.append((w, b))
    return params


def pack_params(params):
    """One-time pad + pack with bias folded in (hoisted out of the per-call path).
    Pad regions are exact zeros so ghost lanes never leak into real outputs."""
    num_layers = len(params)
    fan_ins = [w.shape[1] for w, _ in params]
    fan_outs = [w.shape[0] for w, _ in params]
    k_pad = _round_up(max(fan_ins) + 1, 8)      # +1 lane for the folded bias
    assert k_pad <= N_PAD and max(fan_outs) <= N_PAD, "widen N_PAD for this network"
    w_stack = jnp.zeros((num_layers, k_pad, N_PAD), jnp.float32)
    for j, (w, b) in enumerate(params):
        wt = w.T  # store transposed (in, out) so the kernel computes h @ W
        w_stack = w_stack.at[j, :wt.shape[0], :wt.shape[1]].set(wt)
        if b is not None:  # bias row multiplied by the constant-1 obs lane
            w_stack = w_stack.at[j, k_pad - 1, :b.shape[0]].set(b)
    return w_stack


def reference_forward(obs, params):
    h = obs
    for w, b in params:
        h = jnp.dot(h, w.T, precision=jax.lax.Precision.HIGHEST)
        if b is not None:
            h = h + b
        h = jnp.maximum(h, 0.0)
    return jnp.floor(h)  # h >= 0 after ReLU, so floor == h - frac(h)


if __name__ == "__main__":
    l = 4
    n_hidden_units = [32, 32]
    batch = 8

    key = jax.random.PRNGKey(0)
    k_dem, k_inv, k_ord, k_par = jax.random.split(key, 4)

    current_demand = jax.random.uniform(k_dem, (batch, 1), jnp.float32, 0.0, 10.0)
    current_inventory = jax.random.uniform(k_inv, (batch, 1), jnp.float32, 0.0, 20.0)
    past_orders = jax.random.uniform(k_ord, (batch, l + 2), jnp.float32, 0.0, 5.0)

    params = init_params(k_par, l, n_hidden_units)
    w_stack = pack_params(params)  # padded + bias-folded ONCE, reused every call

    fwd = jax.jit(functools.partial(controller_forward, l=l))
    q = fwd(current_demand, current_inventory, past_orders, w_stack)
    jax.block_until_ready(q)

    # sanity check vs pure-JAX reference
    obs = jnp.concatenate([current_inventory, past_orders[:, -l:]], axis=-1)
    q_ref = reference_forward(obs, params)[:, 0:1]
    assert q.shape == (batch, 1)
    assert jnp.allclose(q, q_ref), (q, q_ref)

    print("KERNEL_OK")
</pallas_src>

<mosaic_0001>
module attributes {stable_mosaic.version = 11 : i64} {
  func.func @_mlp_kernel(%arg0: memref<8x1xf32, #tpu.memory_space<vmem>>, %arg1: memref<8x6xf32, #tpu.memory_space<vmem>>, %arg2: memref<3x40x128xf32, #tpu.memory_space<vmem>>, %arg3: memref<8x128xf32, #tpu.memory_space<vmem>>, %arg4: memref<8x40xf32, #tpu.memory_space<vmem>>) attributes {dimension_semantics = [], scalar_prefetch = 0 : i64, scratch_operands = 1 : i64, tpu.core_type = #tpu.core_type<tc>} {
    %cst = arith.constant 0.000000e+00 : f32
    %0 = vector.broadcast %cst : f32 to vector<8x40xf32>
    %c0 = arith.constant 0 : index
    %c0_0 = arith.constant 0 : index
    %1 = vector.load %arg4[%c0, %c0_0] : memref<8x40xf32, #tpu.memory_space<vmem>>, vector<8x40xf32>
    tpu.vector_store %arg4[%c0, %c0_0], %0 {strides = array<i32>} : memref<8x40xf32, #tpu.memory_space<vmem>>, vector<8x40xf32>,
    %c0_1 = arith.constant 0 : index
    %c0_2 = arith.constant 0 : index
    %2 = vector.load %arg0[%c0_1, %c0_2] : memref<8x1xf32, #tpu.memory_space<vmem>>, vector<8x1xf32>
    %c0_3 = arith.constant 0 : index
    %c0_4 = arith.constant 0 : index
    %3 = vector.load %arg4[%c0_3, %c0_4] : memref<8x40xf32, #tpu.memory_space<vmem>>, vector<8x1xf32>
    tpu.vector_store %arg4[%c0_3, %c0_4], %2 {strides = array<i32>} : memref<8x40xf32, #tpu.memory_space<vmem>>, vector<8x1xf32>,
    %c0_5 = arith.constant 0 : index
    %c2 = arith.constant 2 : index
    %4 = vector.load %arg1[%c0_5, %c2] : memref<8x6xf32, #tpu.memory_space<vmem>>, vector<8x4xf32>
    %c0_6 = arith.constant 0 : index
    %c1 = arith.constant 1 : index
    %5 = vector.load %arg4[%c0_6, %c1] : memref<8x40xf32, #tpu.memory_space<vmem>>, vector<8x4xf32>
    tpu.vector_store %arg4[%c0_6, %c1], %4 {strides = array<i32>} : memref<8x40xf32, #tpu.memory_space<vmem>>, vector<8x4xf32>,
    %cst_7 = arith.constant 1.000000e+00 : f32
    %6 = vector.broadcast %cst_7 : f32 to vector<8x1xf32>
    %c0_8 = arith.constant 0 : index
    %c39 = arith.constant 39 : index
    %7 = vector.load %arg4[%c0_8, %c39] : memref<8x40xf32, #tpu.memory_space<vmem>>, vector<8x1xf32>
    tpu.vector_store %arg4[%c0_8, %c39], %6 {strides = array<i32>} : memref<8x40xf32, #tpu.memory_space<vmem>>, vector<8x1xf32>,
    %c0_9 = arith.constant 0 : index
    %c0_10 = arith.constant 0 : index
    %8 = vector.load %arg4[%c0_9, %c0_10] : memref<8x40xf32, #tpu.memory_space<vmem>>, vector<8x40xf32>
    %9 = tpu.iota {dimensions = array<i32: 1>} : vector<8x40xi32>
    %c0_11 = arith.constant 0 : index
    %c0_12 = arith.constant 0 : index
    %c0_13 = arith.constant 0 : index
    %10 = vector.load %arg2[%c0_11, %c0_12, %c0_13] : memref<3x40x128xf32, #tpu.memory_space<vmem>>, vector<1x40x128xf32>
    %11 = vector.shape_cast %10 : vector<1x40x128xf32> to vector<40x128xf32>
    %cst_14 = arith.constant dense<0.000000e+00> : vector<8x128xf32>
    %12 = tpu.matmul %8, %11, %cst_14 {dimension_numbers = #tpu.dot_dimension_numbers<[1], [0], [0], [1], [0, 0, 1, 1], [], []>, precision = #tpu.contract_precision<fp32>} : vector<8x40xf32>, vector<40x128xf32>, vector<8x128xf32> -> vector<8x128xf32>
    %cst_15 = arith.constant 0.000000e+00 : f32
    %13 = vector.broadcast %cst_15 : f32 to vector<8x128xf32>
    %14 = arith.maximumf %12, %13 : vector<8x128xf32>
    %c39_i32 = arith.constant 39 : i32
    %15 = vector.broadcast %c39_i32 : i32 to vector<8x40xi32>
    %16 = arith.cmpi eq, %9, %15 : vector<8x40xi32>
    %17 = vector.extract_strided_slice %14 {offsets = [0, 0], sizes = [8, 40], strides = [1, 1]} : vector<8x128xf32> to vector<8x40xf32>
    %cst_16 = arith.constant 1.000000e+00 : f32
    %18 = vector.broadcast %cst_16 : f32 to vector<8x40xf32>
    %19 = arith.select %16, %18, %17 : vector<8x40xi1>, vector<8x40xf32>
    %c1_17 = arith.constant 1 : index
    %c0_18 = arith.constant 0 : index
    %c0_19 = arith.constant 0 : index
    %20 = vector.load %arg2[%c1_17, %c0_18, %c0_19] : memref<3x40x128xf32, #tpu.memory_space<vmem>>, vector<1x40x128xf32>
    %21 = vector.shape_cast %20 : vector<1x40x128xf32> to vector<40x128xf32>
    %cst_20 = arith.constant dense<0.000000e+00> : vector<8x128xf32>
    %22 = tpu.matmul %19, %21, %cst_20 {dimension_numbers = #tpu.dot_dimension_numbers<[1], [0], [0], [1], [0, 0, 1, 1], [], []>, precision = #tpu.contract_precision<fp32>} : vector<8x40xf32>, vector<40x128xf32>, vector<8x128xf32> -> vector<8x128xf32>
    %cst_21 = arith.constant 0.000000e+00 : f32
    %23 = vector.broadcast %cst_21 : f32 to vector<8x128xf32>
    %24 = arith.maximumf %22, %23 : vector<8x128xf32>
    %c39_i32_22 = arith.constant 39 : i32
    %25 = vector.broadcast %c39_i32_22 : i32 to vector<8x40xi32>
    %26 = arith.cmpi eq, %9, %25 : vector<8x40xi32>
    %27 = vector.extract_strided_slice %24 {offsets = [0, 0], sizes = [8, 40], strides = [1, 1]} : vector<8x128xf32> to vector<8x40xf32>
    %cst_23 = arith.constant 1.000000e+00 : f32
    %28 = vector.broadcast %cst_23 : f32 to vector<8x40xf32>
    %29 = arith.select %26, %28, %27 : vector<8x40xi1>, vector<8x40xf32>
    %c2_24 = arith.constant 2 : index
    %c0_25 = arith.constant 0 : index
    %c0_26 = arith.constant 0 : index
    %30 = vector.load %arg2[%c2_24, %c0_25, %c0_26] : memref<3x40x128xf32, #tpu.memory_space<vmem>>, vector<1x40x128xf32>
    %31 = vector.shape_cast %30 : vector<1x40x128xf32> to vector<40x128xf32>
    %cst_27 = arith.constant dense<0.000000e+00> : vector<8x128xf32>
    %32 = tpu.matmul %29, %31, %cst_27 {dimension_numbers = #tpu.dot_dimension_numbers<[1], [0], [0], [1], [0, 0, 1, 1], [], []>, precision = #tpu.contract_precision<fp32>} : vector<8x40xf32>, vector<40x128xf32>, vector<8x128xf32> -> vector<8x128xf32>
    %cst_28 = arith.constant 0.000000e+00 : f32
    %33 = vector.broadcast %cst_28 : f32 to vector<8x128xf32>
    %34 = arith.maximumf %32, %33 : vector<8x128xf32>
    %35 = math.floor %34 : vector<8x128xf32>
    %c0_29 = arith.constant 0 : index
    %c0_30 = arith.constant 0 : index
    %36 = vector.load %arg3[%c0_29, %c0_30] : memref<8x128xf32, #tpu.memory_space<vmem>>, vector<8x128xf32>
    tpu.vector_store %arg3[%c0_29, %c0_30], %35 {strides = array<i32>} : memref<8x128xf32, #tpu.memory_space<vmem>>, vector<8x128xf32>,
    return
  }
}

</mosaic_0001>

<bundles_post_ra>
// kernel: controller_forward.1
= control target key start
LH: loop header
LB: loop body
LE: loop exit
PB: predicated region body
PF: predicated region fallthrough
CT: control target
= control target key end

     0   :  { %8 = vsyncpa [#allocation4], 0  ;;  %s1949_s12 = smov [#allocation3]   ;;  %s2351_s0 = inlined_call_operand.vmem [shape: f32[8,1], index: 0, kind: input, shape index: {}]   ;;  %s2352_s1 = inlined_call_operand.vmem [shape: f32[8,6], index: 1, kind: input, shape index: {}]   ;;  %s2353_s2 = inlined_call_operand.hbm [shape: f32[3,40,128], index: 2, kind: input, shape index: {}]   ;;  %s2354_s3 = inlined_call_operand.vmem [shape: f32[8,128], index: 3, kind: output, shape index: {}]  }
   0x1   :  { %s18_s13 = sshll.u32 %s1949_s12, 4  ;;  %s19_s13 = int_to_ptr.vmem [resolvable:$true] %s18_s13 }
   0x2   :  { %s1935_s14 = scalar_lea.vmem %s19_s13, 1920  ;;  %p1940_p1 = scmp.lt.s32.totalorder %s19_s13, %s19_s13 }
   0x3   :  { %p1936_p0 = scmp.ne.s32.totalorder %s19_s13, %s1935_s14  ;;  %p1941_p2 = scmp.lt.s32.totalorder %s1935_s14, %s1935_s14 }
   0x5   :  { %p1942_p3 = por %p1941_p2, %p1940_p1 }
   0x7   :  { %p1943_p4 = pnand %p1942_p3, %p1936_p0 }
   0x9   :  { %1946 = shalt.err (!%p1943_p4)
}
   0xa   :  { %s1950_s15 = smov 128   ;;  %s1951_s16 = smov 8  }
   0xb   :  { %24 = dma.hbm_to_vmem [thread:$0]  %s2353_s2, 1920, %s19_s13, [#allocation4], %s1950_s15, %s1950_s15, %s1951_s16  }
   0xc   :  { %1947 = dma.done.wait [#allocation4], 1920  }
   0xd   :  { %1948 = vsyncadd [#allocation4], 4294965376  ;;  %vm28_vm0 = vcmask 326656   ;;  %v1952_v0 = vmov 0.0   ;;  %vm1953_vm1 = vmmov 0   ;;  %vm31_vm2 = vcmask 7168  }
   0xe   :  { %29 = vst.msk [vmem:[#allocation2] sm:$0xff] %vm28_vm0, %v1952_v0  ;;  %1686 = vmatprep.subr.mxu0 %v1952_v0  ;;  %1699 = vmatprep.subr.mxu1 %v1952_v0  ;;  %v33_v1 = vld [vmem:[%s2352_s1] sm:$0xff]  ;;  %v49_v3 = vld [vmem:[#allocation3 + $0x20] sm:$0xff]  ;;  %s1954_s22 = smov 127   ;;  %v47_v6 = vld [vmem:[#allocation3 + $0x10] sm:$0xff]  ;;  %vm38_vm3 = vcmask 39944  }
   0xf   :  { %1696 = vmatprep.mubr.msk.f32.mxu0 %vm1953_vm1, %v1952_v0  ;;  %1709 = vmatprep.mubr.msk.f32.mxu1 %vm1953_vm1, %v1952_v0  ;;  %v30_v2 = vld [vmem:[%s2351_s0] sm:$0xff]  ;;  %v1993_v4 = vand.u32 4294901760, %v49_v3  ;;  %v46_v7 = vld [vmem:[#allocation3 + $0x8] sm:$0xff]  ;;  %v1997_v9 = vand.u32 4294901760, %v47_v6  ;;  %v45_v11 = vld [vmem:[#allocation3] sm:$0xff]  ;;  %vm40_vm4 = vcmask 326968  }
  0x10   :  { %35 = vrot.lane.b32.xlu0 %v33_v1, %s1954_s22  ;;  %32 = vst.msk [vmem:[#allocation2] sm:$0xff] %vm31_vm2, %v30_v2  ;;  %v48_v5 = vld [vmem:[#allocation3 + $0x18] sm:$0xff]  ;;  %v1999_v10 = vand.u32 4294901760, %v46_v7  ;;  %v2005_v13 = vand.u32 4294901760, %v45_v11  ;;  %v1955_v34 = vmov 1.0   ;;  %v559_v42 = vld [vmem:[#allocation3 + $0x48] sm:$0xff] }
  0x11   :  { %v1995_v8 = vand.u32 4294901760, %v48_v5  ;;  %1687 = vmatpush3.msra.mxu0 %v1993_v4  ;;  %v2003_v12 = vsub.f32 %v49_v3, %v1993_v4  ;;  %v2012_v15 = vsub.f32 %v47_v6, %v1997_v9  ;;  %v2111_v43 = vand.u32 4294901760, %v559_v42  ;;  %v558_v44 = vld [vmem:[#allocation3 + $0x40] sm:$0xff]  ;;  %v557_v47 = vld [vmem:[#allocation3 + $0x38] sm:$0xff]  ;;  %v556_v51 = vld [vmem:[#allocation3 + $0x30] sm:$0xff] }
  0x12   :  { %1688 = vmatprep.subr.mxu0 %v1952_v0  ;;  %v2015_v16 = vsub.f32 %v46_v7, %v1999_v10  ;;  %v2020_v18 = vsub.f32 %v45_v11, %v2005_v13  ;;  %v2116_v46 = vand.u32 4294901760, %v558_v44  ;;  %v2124_v50 = vand.u32 4294901760, %v557_v47  ;;  %v555_v56 = vld [vmem:[#allocation3 + $0x28] sm:$0xff] }
  0x13   :  { %v2009_v14 = vsub.f32 %v48_v5, %v1995_v8  ;;  %v158_v17 = vand.u32 4294901760, %v2003_v12  ;;  %1689 = vmatpush3.msra.mxu0 %v1995_v8  ;;  %v172_v20 = vand.u32 4294901760, %v2012_v15  ;;  %v2114_v45 = vsub.f32 %v559_v42, %v2111_v43 }
  0x14   :  { %1690 = vmatprep.subr.mxu0 %v1952_v0  ;;  %v179_v21 = vand.u32 4294901760, %v2015_v16  ;;  %v186_v23 = vand.u32 4294901760, %v2020_v18  ;;  %v2122_v49 = vsub.f32 %v558_v44, %v2116_v46  ;;  %v2133_v54 = vsub.f32 %v557_v47, %v2124_v50 }
  0x15   :  { %v165_v19 = vand.u32 4294901760, %v2009_v14  ;;  %v159_v22 = vsub.f32 %v2003_v12, %v158_v17  ;;  %1691 = vmatpush3.msra.mxu0 %v1997_v9  ;;  %v173_v25 = vsub.f32 %v2012_v15, %v172_v20  ;;  %v668_v48 = vand.u32 4294901760, %v2114_v45 }
  0x16   :  { %1692 = vmatprep.subr.mxu0 %v1952_v0  ;;  %v180_v27 = vsub.f32 %v2015_v16, %v179_v21  ;;  %v187_v30 = vsub.f32 %v2020_v18, %v186_v23  ;;  %v675_v53 = vand.u32 4294901760, %v2122_v49  ;;  %v2135_v55 = vand.u32 4294901760, %v556_v51 }
  0x17   :  { %v166_v24 = vsub.f32 %v2009_v14, %v165_v19  ;;  %v160_v26 = vand.u32 4294901760, %v159_v22  ;;  %1693 = vmatpush3.msra.mxu0 %v1999_v10  ;;  %v174_v29 = vand.u32 4294901760, %v173_v25  ;;  %v669_v52 = vsub.f32 %v2114_v45, %v668_v48 }
  0x18   :  { %1694 = vmatprep.subr.mxu0 %v1952_v0  ;;  %v181_v31 = vand.u32 4294901760, %v180_v27  ;;  %v188_v32 = vand.u32 4294901760, %v187_v30  ;;  %v676_v58 = vsub.f32 %v2122_v49, %v675_v53  ;;  %v682_v59 = vand.u32 4294901760, %v2133_v54 }
  0x19   :  { %v167_v28 = vand.u32 4294901760, %v166_v24  ;;  %1700 = vmatpush3.msra.mxu1 %v160_v26  ;;  %1695 = vmatpush3.msra.mxu0 %v2005_v13  ;;  %v670_v57 = vand.u32 4294901760, %v669_v52  ;;  %v2144_v60 = vsub.f32 %v556_v51, %v2135_v55  ;;  %v2147_v61 = vand.u32 4294901760, %v555_v56 }
  0x1a   :  { %1701 = vmatprep.subr.mxu1 %v1952_v0  ;;  %1712 = vmatprep.subr.mxu0 %v1952_v0  ;;  %v677_v62 = vand.u32 4294901760, %v676_v58  ;;  %v683_v63 = vsub.f32 %v2133_v54, %v682_v59 }
  0x1b   :  { %1702 = vmatpush3.msra.mxu1 %v167_v28  ;;  %v689_v1 = vand.u32 4294901760, %v2144_v60  ;;  %v2156_v2 = vsub.f32 %v555_v56, %v2147_v61 }
  0x1c   :  { %1703 = vmatprep.subr.mxu1 %v1952_v0  ;;  %v684_v3 = vand.u32 4294901760, %v683_v63 }
  0x1d   :  { %1704 = vmatpush3.msra.mxu1 %v174_v29  ;;  %v696_v5 = vand.u32 4294901760, %v2156_v2 }
  0x1e   :  { %1705 = vmatprep.subr.mxu1 %v1952_v0 }
  0x1f   :  { %1706 = vmatpush3.msra.mxu1 %v181_v31  ;;  %v697_v7 = vsub.f32 %v2156_v2, %v696_v5 }
  0x20   :  { %1707 = vmatprep.subr.mxu1 %v1952_v0 }
  0x21   :  { %1708 = vmatpush3.msra.mxu1 %v188_v32 }
  0x22   :  { %1725 = vmatprep.subr.mxu1 %v1952_v0 }
  0x82   :  { %v36_v33 = vpop.permute.xlu0 %35 }
  0x83   :  { %39 = vst.msk [vmem:[#allocation2] sm:$0xff] %vm38_vm3, %v36_v33 }
  0x84   :  { %41 = vst.msk [vmem:[#allocation2] sm:$0xff] %vm40_vm4, %v1955_v34 }
  0x8b   :  { %v42_v35 = vld [vmem:[#allocation2] sm:$0xff] }
  0x8c   :  { %v51_v36 = vsel %vm28_vm0, %v42_v35, 0 }
  0x8d   :  { %v123_v37 = vand.u32 4294901760, %v51_v36 }
  0x8f   :  { %v124_v38 = vsub.f32 %v51_v36, %v123_v37  ;;  %1710 = vmatmul.mubr.f32.vlgmr.msra.gmra.mxu1 %v123_v37  ;;  %v1068_v36 = vld [vmem:[#allocation3 + $0x70] sm:$0xff] }
  0x90   :  { %1726 = vmatpush3.msra.mxu1 %v1993_v4  ;;  %1735 = vmatprep.mubr.msk.f32.mxu1 %vm1953_vm1, %v1952_v0 }
  0x91   :  { %v125_v39 = vand.u32 4294901760, %v124_v38  ;;  %1727 = vmatprep.subr.mxu1 %v1952_v0 }
  0x92   :  { %1728 = vmatpush3.msra.mxu1 %v1995_v8 }
  0x93   :  { %v126_v40 = vsub.f32 %v124_v38, %v125_v39  ;;  %1729 = vmatprep.subr.mxu1 %v1952_v0 }
  0x94   :  { %1730 = vmatpush3.msra.mxu1 %v1997_v9 }
  0x95   :  { %v127_v41 = vand.u32 4294901760, %v126_v40  ;;  %1731 = vmatprep.subr.mxu1 %v1952_v0 }
  0x96   :  { %1732 = vmatpush3.msra.mxu1 %v1999_v10 }
  0x97   :  { %1697 = vmatmul.mubr.f32.vlgmr.msra.gmra.mxu0 %v127_v41  ;;  %1733 = vmatprep.subr.mxu1 %v1952_v0  ;;  %v1066_v41 = vld [vmem:[#allocation3 + $0x60] sm:$0xff] }
  0x98   :  { %1713 = vmatpush3.msra.mxu0 %v2003_v12  ;;  %1722 = vmatprep.mubr.msk.f32.mxu0 %vm1953_vm1, %v1952_v0  ;;  %v2247_v44 = vand.u32 4294901760, %v1066_v41 }
  0x99   :  { %1714 = vmatprep.subr.mxu0 %v1952_v0  ;;  %1734 = vmatpush3.msra.mxu1 %v2005_v13 }
  0x9a   :  { %1715 = vmatpush3.msra.mxu0 %v2009_v14  ;;  %1751 = vmatprep.subr.mxu1 %v1952_v0 }
  0x9b   :  { %1716 = vmatprep.subr.mxu0 %v1952_v0  ;;  %1736 = vmatmul.mubr.f32.vlgmr.msra.gmra.mxu1 %v125_v39 }
  0x9c   :  { %1717 = vmatpush3.msra.mxu0 %v2012_v15  ;;  %1752 = vmatpush3.msra.mxu1 %v1993_v4  ;;  %v690_v4 = vsub.f32 %v2144_v60, %v689_v1 }
  0x9d   :  { %1718 = vmatprep.subr.mxu0 %v1952_v0  ;;  %1753 = vmatprep.subr.mxu1 %v1952_v0 }
  0x9e   :  { %1719 = vmatpush3.msra.mxu0 %v2015_v16  ;;  %1754 = vmatpush3.msra.mxu1 %v1995_v8  ;;  %v691_v6 = vand.u32 4294901760, %v690_v4  ;;  %v698_v8 = vand.u32 4294901760, %v697_v7 }
  0x9f   :  { %1720 = vmatprep.subr.mxu0 %v1952_v0  ;;  %1755 = vmatprep.subr.mxu1 %v1952_v0 }
  0xa0   :  { %1721 = vmatpush3.msra.mxu0 %v2020_v18  ;;  %1756 = vmatpush3.msra.mxu1 %v1997_v9 }
  0xa1   :  { %1723 = vmatmul.mubr.f32.vlgmr.msra.gmra.mxu0 %v124_v38  ;;  %1738 = vmatprep.subr.mxu0 %v1952_v0  ;;  %v1067_v38 = vld [vmem:[#allocation3 + $0x68] sm:$0xff] }
  0xa2   :  { %1739 = vmatpush3.msra.mxu0 %v158_v17  ;;  %1757 = vmatprep.subr.mxu1 %v1952_v0  ;;  %v2239_v40 = vand.u32 4294901760, %v1067_v38 }
  0xa3   :  { %1740 = vmatprep.subr.mxu0 %v1952_v0  ;;  %1758 = vmatpush3.msra.mxu1 %v1999_v10 }
  0xa4   :  { %1741 = vmatpush3.msra.mxu0 %v165_v19  ;;  %1759 = vmatprep.subr.mxu1 %v1952_v0  ;;  %v43_v19 = vlaneseq }
  0xa5   :  { %1742 = vmatprep.subr.mxu0 %v1952_v0  ;;  %1748 = vmatprep.mubr.msk.f32.mxu0 %vm1953_vm1, %v1952_v0 }
  0xa6   :  { %1743 = vmatpush3.msra.mxu0 %v172_v20  ;;  %1760 = vmatpush3.msra.mxu1 %v2005_v13  ;;  %v2171_v24 = vand.u32 127, %v43_v19 }
  0xa7   :  { %1744 = vmatprep.subr.mxu0 %v1952_v0  ;;  %1761 = vmatprep.mubr.msk.f32.mxu1 %vm1953_vm1, %v1952_v0 }
  0xa8   :  { %1745 = vmatpush3.msra.mxu0 %v179_v21  ;;  %1762 = vmatmul.mubr.f32.vlgmr.msra.gmra.mxu1 %v123_v37  ;;  %vm552_vm5 = vcmp.eq.s32.totalorder %v2171_v24, 39 }
  0xa9   :  { %1746 = vmatprep.subr.mxu0 %v1952_v0  ;;  %1777 = vmatprep.subr.mxu1 %v1952_v0 }
  0xaa   :  { %1747 = vmatpush3.msra.mxu0 %v186_v23  ;;  %1787 = vmatprep.mubr.msk.f32.mxu1 %vm1953_vm1, %v1952_v0 }
  0xab   :  { %1749 = vmatmul.mubr.f32.vlgmr.msra.gmra.mxu0 %v123_v37  ;;  %1764 = vmatprep.subr.mxu0 %v1952_v0  ;;  %v2234_v37 = vand.u32 4294901760, %v1068_v36 }
  0xac   :  { %1774 = vmatprep.mubr.msk.f32.mxu0 %vm1953_vm1, %v1952_v0  ;;  %1765 = vmatpush3.msra.mxu0 %v2111_v43 }
  0xad   :  { %1766 = vmatprep.subr.mxu0 %v1952_v0  ;;  %1778 = vmatpush3.msra.mxu1 %v670_v57  ;;  %v2237_v39 = vsub.f32 %v1068_v36, %v2234_v37 }
  0xae   :  { %1767 = vmatpush3.msra.mxu0 %v2116_v46  ;;  %1779 = vmatprep.subr.mxu1 %v1952_v0 }
  0xaf   :  { %1768 = vmatprep.subr.mxu0 %v1952_v0  ;;  %1780 = vmatpush3.msra.mxu1 %v677_v62  ;;  %v1177_v42 = vand.u32 4294901760, %v2237_v39 }
  0xb0   :  { %1769 = vmatpush3.msra.mxu0 %v2124_v50  ;;  %1781 = vmatprep.subr.mxu1 %v1952_v0 }
  0xb1   :  { %1770 = vmatprep.subr.mxu0 %v1952_v0  ;;  %1782 = vmatpush3.msra.mxu1 %v684_v3 }
  0xb2   :  { %1771 = vmatpush3.msra.mxu0 %v2135_v55  ;;  %1783 = vmatprep.subr.mxu1 %v1952_v0 }
  0xb3   :  { %1772 = vmatprep.subr.mxu0 %v1952_v0  ;;  %1784 = vmatpush3.msra.mxu1 %v691_v6 }
  0xb4   :  { %1773 = vmatpush3.msra.mxu0 %v2147_v61  ;;  %1785 = vmatprep.subr.mxu1 %v1952_v0 }
  0xb5   :  { %1790 = vmatprep.subr.mxu0 %v1952_v0  ;;  %1786 = vmatpush3.msra.mxu1 %v698_v8 }
  0xb6   :  { %1803 = vmatprep.subr.mxu1 %v1952_v0 }
 0x14f   :  { %v225_v9 = vpop.f32.mrf.mxu1 }
 0x151   :  { %v1711_v10 = vpop.f32.mrf.mxu1 }
 0x157   :  { %v129_v11 = vpop.f32.mrf.mxu0 }
 0x158   :  { %v226_v17 = vadd.f32 %v225_v9, %v129_v11 }
 0x159   :  { %v1698_v12 = vpop.f32.mrf.mxu0 }
 0x15b   :  { %v385_v13 = vpop.f32.mrf.mxu1 }
 0x15d   :  { %v1737_v14 = vpop.f32.mrf.mxu1 }
 0x161   :  { %v307_v15 = vpop.f32.mrf.mxu0 }
 0x162   :  { %v308_v18 = vadd.f32 %v307_v15, %v226_v17 }
 0x163   :  { %v1724_v16 = vpop.f32.mrf.mxu0 }
 0x164   :  { %v386_v21 = vadd.f32 %v385_v13, %v308_v18 }
 0x168   :  { %v547_v20 = vpop.f32.mrf.mxu1 }
 0x16a   :  { %v1763_v22 = vpop.f32.mrf.mxu1 }
 0x16b   :  { %v471_v23 = vpop.f32.mrf.mxu0 }
 0x16c   :  { %v472_v25 = vadd.f32 %v471_v23, %v386_v21 }
 0x16d   :  { %v1750_v26 = vpop.f32.mrf.mxu0 }
 0x16e   :  { %v548_v27 = vadd.f32 %v547_v20, %v472_v25 }
 0x170   :  { %v551_v28 = vmax.f32 %v548_v27, 0.0 }
 0x172   :  { %v553_v29 = vsel %vm552_vm5, 1.0, %v551_v28 }
 0x173   :  { %v561_v30 = vsel %vm28_vm0, %v553_v29, 0 }
 0x174   :  { %v633_v31 = vand.u32 4294901760, %v561_v30 }
 0x176   :  { %v634_v32 = vsub.f32 %v561_v30, %v633_v31  ;;  %1788 = vmatmul.mubr.f32.vlgmr.msra.gmra.mxu1 %v633_v31 }
 0x177   :  { %1804 = vmatpush3.msra.mxu1 %v2111_v43  ;;  %1813 = vmatprep.mubr.msk.f32.mxu1 %vm1953_vm1, %v1952_v0 }
 0x178   :  { %v635_v33 = vand.u32 4294901760, %v634_v32  ;;  %1805 = vmatprep.subr.mxu1 %v1952_v0 }
 0x179   :  { %1806 = vmatpush3.msra.mxu1 %v2116_v46 }
 0x17a   :  { %1807 = vmatprep.subr.mxu1 %v1952_v0  ;;  %v636_v34 = vsub.f32 %v634_v32, %v635_v33 }
 0x17b   :  { %1808 = vmatpush3.msra.mxu1 %v2124_v50 }
 0x17c   :  { %1809 = vmatprep.subr.mxu1 %v1952_v0  ;;  %v637_v35 = vand.u32 4294901760, %v636_v34 }
 0x17d   :  { %1810 = vmatpush3.msra.mxu1 %v2135_v55 }
 0x17e   :  { %1811 = vmatprep.subr.mxu1 %v1952_v0  ;;  %1775 = vmatmul.mubr.f32.vlgmr.msra.gmra.mxu0 %v637_v35 }
 0x17f   :  { %1791 = vmatpush3.msra.mxu0 %v2114_v45  ;;  %1812 = vmatpush3.msra.mxu1 %v2147_v61  ;;  %v1065_v45 = vld [vmem:[#allocation3 + $0x58] sm:$0xff] }
 0x180   :  { %1792 = vmatprep.subr.mxu0 %v1952_v0  ;;  %1814 = vmatmul.mubr.f32.vlgmr.msra.gmra.mxu1 %v635_v33 }
 0x181   :  { %1829 = vmatprep.subr.mxu1 %v1952_v0  ;;  %1793 = vmatpush3.msra.mxu0 %v2122_v49  ;;  %v2258_v49 = vand.u32 4294901760, %v1065_v45 }
 0x182   :  { %1830 = vmatpush3.msra.mxu1 %v2111_v43  ;;  %1794 = vmatprep.subr.mxu0 %v1952_v0  ;;  %v2245_v43 = vsub.f32 %v1067_v38, %v2239_v40 }
 0x183   :  { %1831 = vmatprep.subr.mxu1 %v1952_v0  ;;  %1795 = vmatpush3.msra.mxu0 %v2133_v54  ;;  %v2267_v54 = vsub.f32 %v1065_v45, %v2258_v49 }
 0x184   :  { %1832 = vmatpush3.msra.mxu1 %v2116_v46  ;;  %1796 = vmatprep.subr.mxu0 %v1952_v0  ;;  %v1178_v46 = vsub.f32 %v2237_v39, %v1177_v42  ;;  %v1184_v47 = vand.u32 4294901760, %v2245_v43 }
 0x185   :  { %1833 = vmatprep.subr.mxu1 %v1952_v0  ;;  %1797 = vmatpush3.msra.mxu0 %v2144_v60  ;;  %v1198_v58 = vand.u32 4294901760, %v2267_v54 }
 0x186   :  { %1834 = vmatpush3.msra.mxu1 %v2124_v50  ;;  %1798 = vmatprep.subr.mxu0 %v1952_v0  ;;  %v1064_v50 = vld [vmem:[#allocation3 + $0x50] sm:$0xff]  ;;  %v1179_v51 = vand.u32 4294901760, %v1178_v46  ;;  %v1185_v52 = vsub.f32 %v2245_v43, %v1184_v47 }
 0x187   :  { %1835 = vmatprep.subr.mxu1 %v1952_v0  ;;  %1799 = vmatpush3.msra.mxu0 %v2156_v2 }
 0x188   :  { %1800 = vmatprep.mubr.msk.f32.mxu0 %vm1953_vm1, %v1952_v0  ;;  %1836 = vmatpush3.msra.mxu1 %v2135_v55  ;;  %v2270_v55 = vand.u32 4294901760, %v1064_v50  ;;  %v1186_v56 = vand.u32 4294901760, %v1185_v52 }
 0x189   :  { %1801 = vmatmul.mubr.f32.vlgmr.msra.gmra.mxu0 %v634_v32  ;;  %1816 = vmatprep.subr.mxu0 %v1952_v0 }
 0x18a   :  { %1837 = vmatprep.subr.mxu1 %v1952_v0  ;;  %1817 = vmatpush3.msra.mxu0 %v668_v48  ;;  %v2256_v48 = vsub.f32 %v1066_v41, %v2247_v44 }
 0x18b   :  { %1838 = vmatpush3.msra.mxu1 %v2147_v61  ;;  %1839 = vmatprep.mubr.msk.f32.mxu1 %vm1953_vm1, %v1952_v0  ;;  %v1199_v61 = vsub.f32 %v2267_v54, %v1198_v58 }
 0x18c   :  { %1818 = vmatprep.subr.mxu0 %v1952_v0  ;;  %1840 = vmatmul.mubr.f32.vlgmr.msra.gmra.mxu1 %v633_v31 }
 0x18d   :  { %1819 = vmatpush3.msra.mxu0 %v675_v53  ;;  %1826 = vmatprep.mubr.msk.f32.mxu0 %vm1953_vm1, %v1952_v0  ;;  %v1191_v53 = vand.u32 4294901760, %v2256_v48  ;;  %v1200_v63 = vand.u32 4294901760, %v1199_v61 }
 0x18e   :  { %1820 = vmatprep.subr.mxu0 %v1952_v0  ;;  %1855 = vmatprep.subr.mxu1 %v1952_v0 }
 0x18f   :  { %1821 = vmatpush3.msra.mxu0 %v682_v59  ;;  %1865 = vmatprep.mubr.msk.f32.mxu1 %vm1953_vm1, %v1952_v0  ;;  %v1192_v57 = vsub.f32 %v2256_v48, %v1191_v53  ;;  %v2279_v59 = vsub.f32 %v1064_v50, %v2270_v55 }
 0x190   :  { %1822 = vmatprep.subr.mxu0 %v1952_v0  ;;  %1856 = vmatpush3.msra.mxu1 %v1179_v51 }
 0x191   :  { %1823 = vmatpush3.msra.mxu0 %v689_v1  ;;  %1857 = vmatprep.subr.mxu1 %v1952_v0  ;;  %v1193_v60 = vand.u32 4294901760, %v1192_v57  ;;  %v1205_v62 = vand.u32 4294901760, %v2279_v59 }
 0x192   :  { %1824 = vmatprep.subr.mxu0 %v1952_v0  ;;  %1858 = vmatpush3.msra.mxu1 %v1186_v56 }
 0x193   :  { %1825 = vmatpush3.msra.mxu0 %v696_v5  ;;  %1859 = vmatprep.subr.mxu1 %v1952_v0  ;;  %v1206_v1 = vsub.f32 %v2279_v59, %v1205_v62 }
 0x194   :  { %1827 = vmatmul.mubr.f32.vlgmr.msra.gmra.mxu0 %v633_v31  ;;  %1842 = vmatprep.subr.mxu0 %v1952_v0 }
 0x195   :  { %1852 = vmatprep.mubr.msk.f32.mxu0 %vm1953_vm1, %v1952_v0  ;;  %1843 = vmatpush3.msra.mxu0 %v2234_v37  ;;  %v1207_v2 = vand.u32 4294901760, %v1206_v1 }
 0x196   :  { %1844 = vmatprep.subr.mxu0 %v1952_v0  ;;  %1860 = vmatpush3.msra.mxu1 %v1193_v60 }
 0x197   :  { %1845 = vmatpush3.msra.mxu0 %v2239_v40  ;;  %1861 = vmatprep.subr.mxu1 %v1952_v0 }
 0x198   :  { %1846 = vmatprep.subr.mxu0 %v1952_v0  ;;  %1862 = vmatpush3.msra.mxu1 %v1200_v63 }
 0x199   :  { %1847 = vmatpush3.msra.mxu0 %v2247_v44  ;;  %1863 = vmatprep.subr.mxu1 %v1952_v0 }
 0x19a   :  { %1848 = vmatprep.subr.mxu0 %v1952_v0  ;;  %1864 = vmatpush3.msra.mxu1 %v1207_v2 }
 0x19b   :  { %1849 = vmatpush3.msra.mxu0 %v2258_v49  ;;  %1881 = vmatprep.subr.mxu1 %v1952_v0 }
 0x19c   :  { %1850 = vmatprep.subr.mxu0 %v1952_v0 }
 0x19d   :  { %1851 = vmatpush3.msra.mxu0 %v2270_v55 }
 0x19e   :  { %1868 = vmatprep.subr.mxu0 %v1952_v0 }
 0x236   :  { %v735_v3 = vpop.f32.mrf.mxu1 }
 0x238   :  { %v1789_v4 = vpop.f32.mrf.mxu1 }
 0x23e   :  { %v639_v5 = vpop.f32.mrf.mxu0 }
 0x23f   :  { %v736_v12 = vadd.f32 %v735_v3, %v639_v5 }
 0x240   :  { %v895_v6 = vpop.f32.mrf.mxu1  ;;  %v1776_v7 = vpop.f32.mrf.mxu0 }
 0x242   :  { %v1815_v8 = vpop.f32.mrf.mxu1 }
 0x249   :  { %v817_v9 = vpop.f32.mrf.mxu0 }
 0x24a   :  { %v818_v14 = vadd.f32 %v817_v9, %v736_v12 }
 0x24b   :  { %v1802_v10 = vpop.f32.mrf.mxu0 }
 0x24c   :  { %v1057_v11 = vpop.f32.mrf.mxu1  ;;  %v896_v15 = vadd.f32 %v895_v6, %v818_v14 }
 0x24e   :  { %v1841_v13 = vpop.f32.mrf.mxu1 }
 0x254   :  { %v981_v16 = vpop.f32.mrf.mxu0 }
 0x255   :  { %v982_v17 = vadd.f32 %v981_v16, %v896_v15 }
 0x256   :  { %v1828_v18 = vpop.f32.mrf.mxu0 }
 0x257   :  { %v1058_v19 = vadd.f32 %v1057_v11, %v982_v17 }
 0x259   :  { %v1061_v20 = vmax.f32 %v1058_v19, 0.0 }
 0x25b   :  { %v1062_v21 = vsel %vm552_vm5, 1.0, %v1061_v20 }
 0x25c   :  { %v1070_v22 = vsel %vm28_vm0, %v1062_v21, 0 }
 0x25d   :  { %v1142_v23 = vand.u32 4294901760, %v1070_v22 }
 0x25f   :  { %v1143_v25 = vsub.f32 %v1070_v22, %v1142_v23  ;;  %1866 = vmatmul.mubr.f32.vlgmr.msra.gmra.mxu1 %v1142_v23 }
 0x260   :  { %1882 = vmatpush3.msra.mxu1 %v2234_v37  ;;  %1891 = vmatprep.mubr.msk.f32.mxu1 %vm1953_vm1, %v1952_v0 }
 0x261   :  { %1883 = vmatprep.subr.mxu1 %v1952_v0  ;;  %v1144_v26 = vand.u32 4294901760, %v1143_v25 }
 0x262   :  { %1884 = vmatpush3.msra.mxu1 %v2239_v40 }
 0x263   :  { %1885 = vmatprep.subr.mxu1 %v1952_v0  ;;  %v1145_v27 = vsub.f32 %v1143_v25, %v1144_v26 }
 0x264   :  { %1886 = vmatpush3.msra.mxu1 %v2247_v44 }
 0x265   :  { %1887 = vmatprep.subr.mxu1 %v1952_v0  ;;  %v1146_v24 = vand.u32 4294901760, %v1145_v27 }
 0x266   :  { %1888 = vmatpush3.msra.mxu1 %v2258_v49 }
 0x267   :  { %1889 = vmatprep.subr.mxu1 %v1952_v0  ;;  %1853 = vmatmul.mubr.f32.vlgmr.msra.gmra.mxu0 %v1146_v24 }
 0x268   :  { %1869 = vmatpush3.msra.mxu0 %v2237_v39  ;;  %1890 = vmatpush3.msra.mxu1 %v2270_v55 }
 0x269   :  { %1870 = vmatprep.subr.mxu0 %v1952_v0  ;;  %1892 = vmatmul.mubr.f32.vlgmr.msra.gmra.mxu1 %v1144_v26 }
 0x26a   :  { %1907 = vmatprep.subr.mxu1 %v1952_v0  ;;  %1871 = vmatpush3.msra.mxu0 %v2245_v43 }
 0x26b   :  { %1908 = vmatpush3.msra.mxu1 %v2234_v37  ;;  %1872 = vmatprep.subr.mxu0 %v1952_v0 }
 0x26c   :  { %1909 = vmatprep.subr.mxu1 %v1952_v0  ;;  %1873 = vmatpush3.msra.mxu0 %v2256_v48 }
 0x26d   :  { %1910 = vmatpush3.msra.mxu1 %v2239_v40  ;;  %1874 = vmatprep.subr.mxu0 %v1952_v0 }
 0x26e   :  { %1911 = vmatprep.subr.mxu1 %v1952_v0  ;;  %1875 = vmatpush3.msra.mxu0 %v2267_v54 }
 0x26f   :  { %1912 = vmatpush3.msra.mxu1 %v2247_v44  ;;  %1876 = vmatprep.subr.mxu0 %v1952_v0 }
 0x270   :  { %1913 = vmatprep.subr.mxu1 %v1952_v0  ;;  %1877 = vmatpush3.msra.mxu0 %v2279_v59 }
 0x271   :  { %1878 = vmatprep.mubr.msk.f32.mxu0 %vm1953_vm1, %v1952_v0  ;;  %1914 = vmatpush3.msra.mxu1 %v2258_v49 }
 0x272   :  { %1879 = vmatmul.mubr.f32.vlgmr.msra.gmra.mxu0 %v1143_v25  ;;  %1894 = vmatprep.subr.mxu0 %v1952_v0 }
 0x273   :  { %1915 = vmatprep.subr.mxu1 %v1952_v0  ;;  %1895 = vmatpush3.msra.mxu0 %v1177_v42 }
 0x274   :  { %1916 = vmatpush3.msra.mxu1 %v2270_v55  ;;  %1917 = vmatprep.mubr.msk.f32.mxu1 %vm1953_vm1, %v1952_v0 }
 0x275   :  { %1896 = vmatprep.subr.mxu0 %v1952_v0  ;;  %1918 = vmatmul.mubr.f32.vlgmr.msra.gmra.mxu1 %v1142_v23 }
 0x276   :  { %1897 = vmatpush3.msra.mxu0 %v1184_v47  ;;  %1904 = vmatprep.mubr.msk.f32.mxu0 %vm1953_vm1, %v1952_v0 }
 0x277   :  { %1898 = vmatprep.subr.mxu0 %v1952_v0 }
 0x278   :  { %1899 = vmatpush3.msra.mxu0 %v1191_v53 }
 0x279   :  { %1900 = vmatprep.subr.mxu0 %v1952_v0 }
 0x27a   :  { %1901 = vmatpush3.msra.mxu0 %v1198_v58 }
 0x27b   :  { %1902 = vmatprep.subr.mxu0 %v1952_v0 }
 0x27c   :  { %1903 = vmatpush3.msra.mxu0 %v1205_v62 }
 0x27d   :  { %1905 = vmatmul.mubr.f32.vlgmr.msra.gmra.mxu0 %v1142_v23 }
 0x31f   :  { %v1244_v28 = vpop.f32.mrf.mxu1 }
 0x321   :  { %v1867_v29 = vpop.f32.mrf.mxu1 }
 0x327   :  { %v1148_v30 = vpop.f32.mrf.mxu0 }
 0x328   :  { %v1245_v37 = vadd.f32 %v1244_v28, %v1148_v30 }
 0x329   :  { %v1404_v31 = vpop.f32.mrf.mxu1  ;;  %v1854_v32 = vpop.f32.mrf.mxu0 }
 0x32b   :  { %v1893_v33 = vpop.f32.mrf.mxu1 }
 0x332   :  { %v1326_v34 = vpop.f32.mrf.mxu0 }
 0x333   :  { %v1327_v39 = vadd.f32 %v1326_v34, %v1245_v37 }
 0x334   :  { %v1880_v35 = vpop.f32.mrf.mxu0 }
 0x335   :  { %v1566_v36 = vpop.f32.mrf.mxu1  ;;  %v1405_v40 = vadd.f32 %v1404_v31, %v1327_v39 }
 0x337   :  { %v1919_v38 = vpop.f32.mrf.mxu1 }
 0x33d   :  { %v1490_v41 = vpop.f32.mrf.mxu0 }
 0x33e   :  { %v1491_v42 = vadd.f32 %v1490_v41, %v1405_v40 }
 0x33f   :  { %v1906_v0 = vpop.f32.mrf.mxu0 }
 0x340   :  { %v1567_v43 = vadd.f32 %v1566_v36, %v1491_v42 }
 0x342   :  { %v1570_v44 = vmax.f32 %v1567_v43, 0.0 }
 0x344   :  { %v1571_v45 = vfloor.f32 %v1570_v44 }
 0x346   :  { %1572 = vst [vmem:[%s2354_s3] sm:$0xff] %v1571_v45 }
 0x347   :  { %1577 = vsyncpa [#allocation4], 1 }

</bundles_post_ra>
